<compile_context>
chip_gen: v6e
topology: v6e:2x2x1
jax: 0.10.0
libtpu: 0.0.40
codegen_flags: <defaults>
</compile_context>

<pallas_src>
import functools

import numpy as np
import jax
import jax.numpy as jnp
from jax.experimental import pallas as pl
from jax.experimental.pallas import tpu as pltpu


# --------------------------------------------------------------------------- #
# Kernel: one (row_tile, T_out) output block per grid step
# --------------------------------------------------------------------------- #
def _dwconv_kernel(*refs, K, stride, T_out, has_bias):
    if has_bias:
        x_ref, w_ref, b_ref, o_ref = refs
    else:
        x_ref, w_ref, o_ref = refs
        b_ref = None

    w = w_ref[...].astype(jnp.float32)                          # (Ct, K), tiny
    acc = None
    for k in range(K):                                          # static unroll
        p, q = k % stride, k // stride                          # phase, offset
        tap = x_ref[p, :, q:q + T_out].astype(jnp.float32)      # (Ct, T_out)
        term = tap * w[:, k:k + 1]                              # lane broadcast
        acc = term if acc is None else acc + term
    if has_bias:
        acc = acc + b_ref[...].astype(jnp.float32)              # (Ct, 1) bcast
    o_ref[...] = acc.astype(o_ref.dtype)                        # full-block store


# --------------------------------------------------------------------------- #
# Wrapper
# --------------------------------------------------------------------------- #
def depthwise_conv1d_pallas(x, weight, bias=None, *, stride=1, padding=0,
                            row_tile=256):
    """Depthwise Conv1d, PyTorch semantics.

    x:      (B, C_in, T)
    weight: (C_out, K)   (PyTorch Conv1d weight (C_out, 1, K) squeezed)
    bias:   (C_out,) or None
    returns (B, C_out, (T + 2*padding - K)//stride + 1)
    """
    B, C_in, T = x.shape
    C_out, K = weight.shape
    assert C_out % C_in == 0, "out_channels must be a multiple of in_channels"
    mult = C_out // C_in
    s = int(stride)
    assert s >= 1 and padding >= 0
    T_pad = T + 2 * padding
    assert T_pad >= K, "kernel larger than padded input"
    T_out = (T_pad - K) // s + 1

    # ---------------- input prep (cheap, one-shot XLA data movement) -------- #
    xr = x
    if mult > 1:
        # Row j (within a batch element) == input channel j // mult, so
        # weights/bias stay in native PyTorch order and the kernel writes the
        # output directly in PyTorch channel order (no output transpose).
        xr = jnp.repeat(xr, mult, axis=1)                        # (B, C_out, T)
    R = B * C_out
    xr = xr.reshape(R, T)
    if padding > 0:
        xr = jnp.pad(xr, ((0, 0), (padding, padding)))           # (R, T_pad)

    # Phase split for stride: padded index t*s + k -> phase k%s, offset t+k//s,
    # so the kernel only needs contiguous static lane slices (no strided I/O).
    T_phase = max(-(-T_pad // s), T_out + (K - 1) // s)
    if s > 1:
        tail = T_phase * s - T_pad
        if tail:
            xr = jnp.pad(xr, ((0, 0), (0, tail)))
        xr = xr.reshape(R, T_phase, s).transpose(2, 0, 1)        # (s, R, T_phase)
    else:
        xr = xr.reshape(1, R, T_phase)

    # Per-row weights / bias in PyTorch output-channel order.
    w_rows = jnp.tile(weight, (B, 1))                            # (R, K)
    b_rows = (jnp.tile(bias.reshape(C_out, 1), (B, 1))
              if bias is not None else None)                     # (R, 1)

    # Row padding so every grid step is a full, sublane-dense tile.
    row_tile = max(8, (row_tile // 8) * 8)
    R_pad = -(-R // 8) * 8
    if R_pad > row_tile:
        R_pad = -(-R_pad // row_tile) * row_tile
        Ct = row_tile
    else:
        Ct = R_pad
    if R_pad != R:
        pr = R_pad - R
        xr = jnp.pad(xr, ((0, 0), (0, pr), (0, 0)))
        w_rows = jnp.pad(w_rows, ((0, pr), (0, 0)))
        if b_rows is not None:
            b_rows = jnp.pad(b_rows, ((0, pr), (0, 0)))

    kernel = functools.partial(_dwconv_kernel, K=K, stride=s, T_out=T_out,
                               has_bias=bias is not None)

    in_specs = [
        pl.BlockSpec((s, Ct, T_phase), lambda i: (0, i, 0)),
        pl.BlockSpec((Ct, K), lambda i: (i, 0)),
    ]
    operands = [xr, w_rows]
    if bias is not None:
        in_specs.append(pl.BlockSpec((Ct, 1), lambda i: (i, 0)))
        operands.append(b_rows)

    out_rows = pl.pallas_call(
        kernel,
        out_shape=jax.ShapeDtypeStruct((R_pad, T_out), x.dtype),
        grid=(R_pad // Ct,),
        in_specs=in_specs,
        out_specs=pl.BlockSpec((Ct, T_out), lambda i: (i, 0)),
        compiler_params=pltpu.CompilerParams(
            dimension_semantics=("parallel",)),
    )(*operands)

    return out_rows[:R].reshape(B, C_out, T_out)


# --------------------------------------------------------------------------- #
# Pure-NumPy reference (PyTorch Conv1d, groups = in_channels)
# --------------------------------------------------------------------------- #
def depthwise_conv1d_ref(x, weight, bias=None, *, stride=1, padding=0):
    x = np.asarray(x, np.float32)
    w = np.asarray(weight, np.float32)
    B, C_in, T = x.shape
    C_out, K = w.shape
    mult = C_out // C_in
    xp = np.pad(x, ((0, 0), (0, 0), (padding, padding)))
    T_out = (T + 2 * padding - K) // stride + 1
    out = np.zeros((B, C_out, T_out), np.float32)
    for j in range(C_out):
        g = j // mult
        for t in range(T_out):
            ss = t * stride
            out[:, j, t] = (xp[:, g, ss:ss + K] * w[j]).sum(-1)
    if bias is not None:
        out = out + np.asarray(bias, np.float32)[None, :, None]
    return out


# --------------------------------------------------------------------------- #
if __name__ == "__main__":
    key = jax.random.PRNGKey(0)
    kx, kw1, kw2, kb = jax.random.split(key, 4)

    B, C_in, T, K = 2, 4, 16, 3
    x = jax.random.normal(kx, (B, C_in, T), jnp.float32)

    # Config 1: module defaults (out_channels == in_channels, stride=1,
    # padding=0, bias=False).
    w1 = jax.random.normal(kw1, (C_in, K), jnp.float32) / (K ** 0.5)
    out1 = jax.block_until_ready(depthwise_conv1d_pallas(x, w1))
    ref1 = depthwise_conv1d_ref(x, w1)
    assert out1.shape == (B, C_in, T - K + 1)
    np.testing.assert_allclose(np.asarray(out1), ref1, rtol=1e-5, atol=1e-5)

    # Config 2: channel multiplier 2, padding=2, stride=2, with bias
    # (exercises in-kernel phase/stride path, row padding, bias add).
    mult = 2
    C_out = mult * C_in
    w2 = jax.random.normal(kw2, (C_out, K), jnp.float32) / (K ** 0.5)
    b2 = jax.random.normal(kb, (C_out,), jnp.float32) * 0.1
    out2 = jax.block_until_ready(
        depthwise_conv1d_pallas(x, w2, b2, stride=2, padding=2))
    ref2 = depthwise_conv1d_ref(x, w2, b2, stride=2, padding=2)
    assert out2.shape == (B, C_out, (T + 2 * 2 - K) // 2 + 1)
    np.testing.assert_allclose(np.asarray(out2), ref2, rtol=1e-5, atol=1e-5)

    # Config 3: bf16 I/O (f32 accumulate in-kernel), padding=1, with bias.
    x_bf = x.astype(jnp.bfloat16)
    w_bf = w1.astype(jnp.bfloat16)
    b_bf = (jax.random.normal(kb, (C_in,), jnp.float32) * 0.1).astype(jnp.bfloat16)
    out3 = jax.block_until_ready(
        depthwise_conv1d_pallas(x_bf, w_bf, b_bf, padding=1))
    ref3 = depthwise_conv1d_ref(np.asarray(x_bf, np.float32),
                                np.asarray(w_bf, np.float32),
                                np.asarray(b_bf, np.float32), padding=1)
    assert out3.shape == (B, C_in, T)
    np.testing.assert_allclose(np.asarray(out3, np.float32), ref3,
                               rtol=2e-2, atol=2e-2)

    print("KERNEL_OK")
</pallas_src>

<mosaic_0001>
module attributes {stable_mosaic.version = 11 : i64} {
  func.func @_dwconv_kernel(%arg0: i32, %arg1: memref<1x8x16xf32, #tpu.memory_space<vmem>>, %arg2: memref<8x3xf32, #tpu.memory_space<vmem>>, %arg3: memref<8x14xf32, #tpu.memory_space<vmem>>) attributes {dimension_semantics = [#tpu.dimension_semantics<parallel>], iteration_bounds = array<i64: 1>, scalar_prefetch = 0 : i64, scratch_operands = 0 : i64, tpu.core_type = #tpu.core_type<tc>, window_params = [{transform_indices = @transform_0, window_bounds = array<i64: 1, 8, 16>}, {transform_indices = @transform_1, window_bounds = array<i64: 8, 3>}, {transform_indices = @transform_2, window_bounds = array<i64: 8, 14>}]} {
    %c0 = arith.constant 0 : index
    %c0_0 = arith.constant 0 : index
    %0 = vector.load %arg2[%c0, %c0_0] : memref<8x3xf32, #tpu.memory_space<vmem>>, vector<8x3xf32>
    %c0_1 = arith.constant 0 : index
    %c0_2 = arith.constant 0 : index
    %c0_3 = arith.constant 0 : index
    %1 = vector.load %arg1[%c0_1, %c0_2, %c0_3] : memref<1x8x16xf32, #tpu.memory_space<vmem>>, vector<1x8x14xf32>
    %2 = vector.shape_cast %1 : vector<1x8x14xf32> to vector<8x14xf32>
    %3 = vector.extract_strided_slice %0 {offsets = [0, 0], sizes = [8, 1], strides = [1, 1]} : vector<8x3xf32> to vector<8x1xf32>
    %4 = vector.broadcast %3 : vector<8x1xf32> to vector<8x14xf32>
    %5 = arith.mulf %2, %4 : vector<8x14xf32>
    %c0_4 = arith.constant 0 : index
    %c0_5 = arith.constant 0 : index
    %c1 = arith.constant 1 : index
    %6 = vector.load %arg1[%c0_4, %c0_5, %c1] : memref<1x8x16xf32, #tpu.memory_space<vmem>>, vector<1x8x14xf32>
    %7 = vector.shape_cast %6 : vector<1x8x14xf32> to vector<8x14xf32>
    %8 = vector.extract_strided_slice %0 {offsets = [0, 1], sizes = [8, 1], strides = [1, 1]} : vector<8x3xf32> to vector<8x1xf32>
    %9 = vector.broadcast %8 : vector<8x1xf32> to vector<8x14xf32>
    %10 = arith.mulf %7, %9 : vector<8x14xf32>
    %11 = arith.addf %5, %10 : vector<8x14xf32>
    %c0_6 = arith.constant 0 : index
    %c0_7 = arith.constant 0 : index
    %c2 = arith.constant 2 : index
    %12 = vector.load %arg1[%c0_6, %c0_7, %c2] : memref<1x8x16xf32, #tpu.memory_space<vmem>>, vector<1x8x14xf32>
    %13 = vector.shape_cast %12 : vector<1x8x14xf32> to vector<8x14xf32>
    %14 = vector.extract_strided_slice %0 {offsets = [0, 2], sizes = [8, 1], strides = [1, 1]} : vector<8x3xf32> to vector<8x1xf32>
    %15 = vector.broadcast %14 : vector<8x1xf32> to vector<8x14xf32>
    %16 = arith.mulf %13, %15 : vector<8x14xf32>
    %17 = arith.addf %11, %16 : vector<8x14xf32>
    %c0_8 = arith.constant 0 : index
    %c0_9 = arith.constant 0 : index
    %18 = vector.load %arg3[%c0_8, %c0_9] : memref<8x14xf32, #tpu.memory_space<vmem>>, vector<8x14xf32>
    tpu.vector_store %arg3[%c0_8, %c0_9], %17 {strides = array<i32>} : memref<8x14xf32, #tpu.memory_space<vmem>>, vector<8x14xf32>,
    return
  }
  func.func @transform_0(%arg0: i32) -> (i32, i32, i32) {
    %c0_i32 = arith.constant 0 : i32
    %c0_i32_0 = arith.constant 0 : i32
    %c0_i32_1 = arith.constant 0 : i32
    return %c0_i32, %arg0, %c0_i32_0 : i32, i32, i32
  }
  func.func @transform_1(%arg0: i32) -> (i32, i32) {
    %c0_i32 = arith.constant 0 : i32
    %c0_i32_0 = arith.constant 0 : i32
    return %arg0, %c0_i32 : i32, i32
  }
  func.func @transform_2(%arg0: i32) -> (i32, i32) {
    %c0_i32 = arith.constant 0 : i32
    %c0_i32_0 = arith.constant 0 : i32
    return %arg0, %c0_i32 : i32, i32
  }
}

</mosaic_0001>

<bundles_post_ra>
// kernel: tpu_custom_call.1
= control target key start
LH: loop header
LB: loop body
LE: loop exit
PB: predicated region body
PF: predicated region fallthrough
CT: control target
= control target key end

     0   :  { %v87_v1 = vmov 1   ;;  %v88_v2 = vmov 0   ;;  %s117_s0 = inlined_call_operand.vmem [shape: f32[1,8,16], index: 0, kind: input, shape index: {}]   ;;  %s118_s1 = inlined_call_operand.vmem [shape: f32[8,3], index: 1, kind: input, shape index: {}]   ;;  %s119_s2 = inlined_call_operand.hbm [shape: f32[8,14], index: 2, kind: output, shape index: {}]  }
   0x1   :  { %v12_v0 = vld [vmem:[%s118_s1] sm:$0xff]  ;;  %62 = vset.pattern.permute.xlu0 %v87_v1  ;;  %64 = vset.pattern.permute.xlu1 %v88_v2 }
   0x2   :  { %7 = vsyncpa [#allocation3], 0  ;;  %21 = vperm.xlu0 %62, %v12_v0   ;;  %16 = vperm.xlu1 %64, %v12_v0   ;;  %v89_v3 = vmov 2   ;;  %v13_v4 = vld [vmem:[%s117_s0] sm:$0xff]  ;;  %s90_s13 = smov 127   ;;  %s91_s1 = smov 126  }
   0x3   :  { %s92_s14 = smov [#allocation2]   ;;  %vm40_vm0 = vcmask 113664  }
   0x4   :  { %s48_s15 = sshll.u32 %s92_s14, 4  ;;  %s49_s15 = int_to_ptr.vmem [resolvable:$true] %s48_s15 }
   0x5   :  { %s65_s0 = scalar_lea.vmem %s49_s15, 128  ;;  %p70_p1 = scmp.lt.s32.totalorder %s49_s15, %s49_s15 }
   0x6   :  { %63 = vset.pattern.permute.xlu0 %v89_v3  ;;  %p66_p0 = scmp.ne.s32.totalorder %s49_s15, %s65_s0  ;;  %p71_p2 = scmp.lt.s32.totalorder %s65_s0, %s65_s0 }
   0x7   :  { %31 = vperm.xlu0 %63, %v12_v0  }
   0x8   :  { %p72_p3 = por %p71_p2, %p70_p1 }
   0xa   :  { %p73_p4 = pnand %p72_p3, %p66_p0 }
  0x7d   :  { %v22_v5 = vpop.permute.xlu0 %21  ;;  %v17_v9 = vpop.permute.xlu1 %16 }
  0x7e   :  { %v24_v6 = vmul.f32 %v22_v5, %v13_v4  ;;  %v19_v10 = vmul.f32 %v17_v9, %v13_v4 }
  0x80   :  { %26 = vrot.lane.b32.xlu1 %v24_v6, %s90_s13 }
  0x82   :  { %v32_v7 = vpop.permute.xlu0 %31 }
  0x83   :  { %v34_v8 = vmul.f32 %v32_v7, %v13_v4 }
  0x85   :  { %36 = vrot.lane.b32.xlu1 %v34_v8, %s91_s1 }
  0xf2   :  { %v27_v11 = vpop.permute.xlu1 %26 }
  0xf3   :  { %v29_v12 = vadd.f32 %v27_v11, %v19_v10 }
  0xf7   :  { %v37_v13 = vpop.permute.xlu1 %36 }
  0xf8   :  { %v39_v14 = vadd.f32 %v37_v13, %v29_v12 }
  0xfa   :  { %41 = vst.msk [vmem:[#allocation2] sm:$0xff] %vm40_vm0, %v39_v14 }
  0xfb   :  { %76 = shalt.err (!%p73_p4)
}
  0xfc   :  { %51 = dma.vmem_to_hbm [thread:$0]  %s49_s15, 128, %s119_s2, [#allocation3]  }
  0xfd   :  { %85 = dma.done.wait [#allocation3], 128  }
  0xfe   :  { %86 = vsyncadd [#allocation3], 4294967168 }
  0xff   :  { %55 = vsyncpa [#allocation3], 1 }

</bundles_post_ra>
